<compile_context>
chip_gen: v6e
topology: v6e:2x2x1
jax: 0.10.0
libtpu: 0.0.40
codegen_flags: <defaults>
</compile_context>

<pallas_src>
import jax
import jax.numpy as jnp
from jax.experimental import pallas as pl
from jax.experimental.pallas import tpu as pltpu

LANE = 128
SUBLANE = 8
HIDDEN = 256
DEFAULT_TM = 1024  # batch-tile rows (multiple of 8); clamped to the batch below.


def _round_up(n, m):
    return (n + m - 1) // m * m


def generator_kernel(x_ref, w1_ref, b1_ref, w2_ref, b2_ref, w3_ref, b3_ref, o_ref):
    # x_ref: (TM, K1) f32; wN_ref: bf16 (in, out); bN_ref: f32 (1, out); o_ref: (TM, data_dim)
    x = x_ref[...].astype(jnp.bfloat16)  # in-kernel cast; avoids an extra XLA pass over x
    # Layer 1: Linear (bf16 operands, f32 accumulate) + LeakyReLU(0.2) in f32
    h = jnp.dot(x, w1_ref[...], preferred_element_type=jnp.float32) + b1_ref[...]
    h = jnp.where(h > 0, h, 0.2 * h)
    # Layer 2
    h = jnp.dot(h.astype(jnp.bfloat16), w2_ref[...],
                preferred_element_type=jnp.float32) + b2_ref[...]
    h = jnp.where(h > 0, h, 0.2 * h)
    # Layer 3 + Tanh (EUP)
    h = jnp.dot(h.astype(jnp.bfloat16), w3_ref[...],
                preferred_element_type=jnp.float32) + b3_ref[...]
    o_ref[...] = jnp.tanh(h).astype(o_ref.dtype)


def generator_forward(x, params, *, tm=DEFAULT_TM, out_dtype=jnp.float32):
    """x: (batch, input_dim) f32. params: f32 (w1,b1,w2,b2,w3,b3), wN shaped (in, out)."""
    w1, b1, w2, b2, w3, b3 = params
    batch, input_dim = x.shape
    hidden = w1.shape[1]
    data_dim = w3.shape[1]

    # Batch tile: multiple of 8 (sublane), never larger than the rounded-up batch.
    tm = max(SUBLANE, min(int(tm), _round_up(batch, SUBLANE)))
    tm = _round_up(tm, SUBLANE)
    grid = (pl.cdiv(batch, tm),)  # ragged last tile is masked by Pallas: no pad, no slice

    # One-time bf16 cast of the small, VMEM-resident weights; biases stay f32.
    w1_b = w1.astype(jnp.bfloat16)
    w2_b = w2.astype(jnp.bfloat16)
    w3_b = w3.astype(jnp.bfloat16)

    flops = 2 * batch * (input_dim * hidden + hidden * hidden + hidden * data_dim)
    bytes_accessed = (
        x.size * x.dtype.itemsize
        + (w1_b.size + w2_b.size + w3_b.size) * 2
        + (b1.size + b2.size + b3.size) * 4
        + batch * data_dim * jnp.dtype(out_dtype).itemsize
    )

    return pl.pallas_call(
        generator_kernel,
        out_shape=jax.ShapeDtypeStruct((batch, data_dim), out_dtype),
        grid_spec=pltpu.PrefetchScalarGridSpec(
            num_scalar_prefetch=0,
            grid=grid,
            in_specs=[
                # Activations: tiled over batch (auto double-buffered DMA), native f32.
                pl.BlockSpec((tm, input_dim), lambda i: (i, 0)),
                # Weights / biases: resident across all grid steps.
                pl.BlockSpec((input_dim, hidden), lambda i: (0, 0)),
                pl.BlockSpec((1, hidden), lambda i: (0, 0)),
                pl.BlockSpec((hidden, hidden), lambda i: (0, 0)),
                pl.BlockSpec((1, hidden), lambda i: (0, 0)),
                pl.BlockSpec((hidden, data_dim), lambda i: (0, 0)),
                pl.BlockSpec((1, data_dim), lambda i: (0, 0)),
            ],
            out_specs=pl.BlockSpec((tm, data_dim), lambda i: (i, 0)),
        ),
        compiler_params=pltpu.CompilerParams(
            dimension_semantics=("parallel",),   # megacore sharding of batch tiles
            vmem_limit_bytes=32 * 1024 * 1024,   # headroom for tm up to ~2048 on v5e too
        ),
        cost_estimate=pl.CostEstimate(
            flops=flops,
            transcendentals=batch * data_dim,
            bytes_accessed=bytes_accessed,
        ),
    )(x, w1_b, b1, w2_b, b2, w3_b, b3)


def init_params(key, input_dim, data_dim, hidden=HIDDEN):
    # Deterministic synthetic init (PyTorch-style uniform(-1/sqrt(fan_in), 1/sqrt(fan_in))).
    ks = jax.random.split(key, 6)

    def lin(kw, kb, fan_in, fan_out):
        bound = 1.0 / jnp.sqrt(fan_in)
        w = jax.random.uniform(kw, (fan_in, fan_out), jnp.float32, -bound, bound)
        b = jax.random.uniform(kb, (1, fan_out), jnp.float32, -bound, bound)
        return w, b

    w1, b1 = lin(ks[0], ks[1], input_dim, hidden)
    w2, b2 = lin(ks[2], ks[3], hidden, hidden)
    w3, b3 = lin(ks[4], ks[5], hidden, data_dim)
    return (w1, b1, w2, b2, w3, b3)


def reference_forward(x, params):
    # Full-precision (f32) reference of the PyTorch module semantics.
    w1, b1, w2, b2, w3, b3 = params
    h = x @ w1 + b1
    h = jnp.where(h > 0, h, 0.2 * h)
    h = h @ w2 + b2
    h = jnp.where(h > 0, h, 0.2 * h)
    h = h @ w3 + b3
    return jnp.tanh(h)


if __name__ == "__main__":
    key = jax.random.PRNGKey(0)
    k_x, k_p = jax.random.split(key)

    input_dim, data_dim = 32, 64
    params = init_params(k_p, input_dim, data_dim)

    # batch=8: exact tile; batch=13: exercises the ragged last batch tile
    # (no wrapper padding, no post-kernel slice).
    for batch in (8, 13):
        x = jax.random.normal(jax.random.fold_in(k_x, batch),
                              (batch, input_dim), dtype=jnp.float32)
        out = jax.block_until_ready(generator_forward(x, params))
        ref = reference_forward(x, params)
        assert out.shape == (batch, data_dim)
        # bf16 matmul operands (f32 accumulate) -> loosened tolerance vs the f32 reference.
        assert jnp.allclose(out, ref, atol=3e-2, rtol=3e-2), (
            f"batch={batch}: mismatch vs reference, "
            f"max abs err={float(jnp.max(jnp.abs(out - ref)))}"
        )

    print("KERNEL_OK")
</pallas_src>

<mosaic_0001>
module attributes {stable_mosaic.version = 11 : i64} {
  func.func @generator_kernel(%arg0: i32, %arg1: memref<8x32xf32, #tpu.memory_space<vmem>>, %arg2: memref<32x256xbf16, #tpu.memory_space<vmem>>, %arg3: memref<1x256xf32, #tpu.memory_space<vmem>>, %arg4: memref<256x256xbf16, #tpu.memory_space<vmem>>, %arg5: memref<1x256xf32, #tpu.memory_space<vmem>>, %arg6: memref<256x64xbf16, #tpu.memory_space<vmem>>, %arg7: memref<1x64xf32, #tpu.memory_space<vmem>>, %arg8: memref<8x64xf32, #tpu.memory_space<vmem>>) attributes {dimension_semantics = [#tpu.dimension_semantics<parallel>], iteration_bounds = array<i64: 1>, scalar_prefetch = 0 : i64, scratch_operands = 0 : i64, tpu.core_type = #tpu.core_type<tc>, window_params = [{transform_indices = @transform_0, window_bounds = array<i64: 8, 32>}, {pipeline_mode = #tpu.pipeline_mode<synchronous>, transform_indices = @transform_1, window_bounds = array<i64: 32, 256>}, {pipeline_mode = #tpu.pipeline_mode<synchronous>, transform_indices = @transform_2, window_bounds = array<i64: 1, 256>}, {pipeline_mode = #tpu.pipeline_mode<synchronous>, transform_indices = @transform_3, window_bounds = array<i64: 256, 256>}, {pipeline_mode = #tpu.pipeline_mode<synchronous>, transform_indices = @transform_4, window_bounds = array<i64: 1, 256>}, {pipeline_mode = #tpu.pipeline_mode<synchronous>, transform_indices = @transform_5, window_bounds = array<i64: 256, 64>}, {pipeline_mode = #tpu.pipeline_mode<synchronous>, transform_indices = @transform_6, window_bounds = array<i64: 1, 64>}, {transform_indices = @transform_7, window_bounds = array<i64: 8, 64>}]} {
    %c0 = arith.constant 0 : index
    %c0_0 = arith.constant 0 : index
    %0 = vector.load %arg1[%c0, %c0_0] : memref<8x32xf32, #tpu.memory_space<vmem>>, vector<8x32xf32>
    %1 = arith.truncf %0 : vector<8x32xf32> to vector<8x32xbf16>
    %c0_1 = arith.constant 0 : index
    %c0_2 = arith.constant 0 : index
    %2 = vector.load %arg2[%c0_1, %c0_2] : memref<32x256xbf16, #tpu.memory_space<vmem>>, vector<32x256xbf16>
    %cst = arith.constant dense<0.000000e+00> : vector<8x256xf32>
    %3 = tpu.matmul %1, %2, %cst {dimension_numbers = #tpu.dot_dimension_numbers<[1], [0], [0], [1], [0, 0, 1, 1], [], []>} : vector<8x32xbf16>, vector<32x256xbf16>, vector<8x256xf32> -> vector<8x256xf32>
    %c0_3 = arith.constant 0 : index
    %c0_4 = arith.constant 0 : index
    %4 = vector.load %arg3[%c0_3, %c0_4] : memref<1x256xf32, #tpu.memory_space<vmem>>, vector<1x256xf32>
    %5 = vector.broadcast %4 : vector<1x256xf32> to vector<8x256xf32>
    %6 = arith.addf %3, %5 : vector<8x256xf32>
    %cst_5 = arith.constant 0.000000e+00 : f32
    %7 = vector.broadcast %cst_5 : f32 to vector<8x256xf32>
    %8 = arith.cmpf ogt, %6, %7 : vector<8x256xf32>
    %cst_6 = arith.constant 2.000000e-01 : f32
    %9 = vector.broadcast %cst_6 : f32 to vector<8x256xf32>
    %10 = arith.mulf %9, %6 : vector<8x256xf32>
    %11 = arith.select %8, %6, %10 : vector<8x256xi1>, vector<8x256xf32>
    %12 = arith.truncf %11 : vector<8x256xf32> to vector<8x256xbf16>
    %c0_7 = arith.constant 0 : index
    %c0_8 = arith.constant 0 : index
    %13 = vector.load %arg4[%c0_7, %c0_8] : memref<256x256xbf16, #tpu.memory_space<vmem>>, vector<256x256xbf16>
    %cst_9 = arith.constant dense<0.000000e+00> : vector<8x256xf32>
    %14 = tpu.matmul %12, %13, %cst_9 {dimension_numbers = #tpu.dot_dimension_numbers<[1], [0], [0], [1], [0, 0, 1, 1], [], []>} : vector<8x256xbf16>, vector<256x256xbf16>, vector<8x256xf32> -> vector<8x256xf32>
    %c0_10 = arith.constant 0 : index
    %c0_11 = arith.constant 0 : index
    %15 = vector.load %arg5[%c0_10, %c0_11] : memref<1x256xf32, #tpu.memory_space<vmem>>, vector<1x256xf32>
    %16 = vector.broadcast %15 : vector<1x256xf32> to vector<8x256xf32>
    %17 = arith.addf %14, %16 : vector<8x256xf32>
    %cst_12 = arith.constant 0.000000e+00 : f32
    %18 = vector.broadcast %cst_12 : f32 to vector<8x256xf32>
    %19 = arith.cmpf ogt, %17, %18 : vector<8x256xf32>
    %cst_13 = arith.constant 2.000000e-01 : f32
    %20 = vector.broadcast %cst_13 : f32 to vector<8x256xf32>
    %21 = arith.mulf %20, %17 : vector<8x256xf32>
    %22 = arith.select %19, %17, %21 : vector<8x256xi1>, vector<8x256xf32>
    %23 = arith.truncf %22 : vector<8x256xf32> to vector<8x256xbf16>
    %c0_14 = arith.constant 0 : index
    %c0_15 = arith.constant 0 : index
    %24 = vector.load %arg6[%c0_14, %c0_15] : memref<256x64xbf16, #tpu.memory_space<vmem>>, vector<256x64xbf16>
    %cst_16 = arith.constant dense<0.000000e+00> : vector<8x64xf32>
    %25 = tpu.matmul %23, %24, %cst_16 {dimension_numbers = #tpu.dot_dimension_numbers<[1], [0], [0], [1], [0, 0, 1, 1], [], []>} : vector<8x256xbf16>, vector<256x64xbf16>, vector<8x64xf32> -> vector<8x64xf32>
    %c0_17 = arith.constant 0 : index
    %c0_18 = arith.constant 0 : index
    %26 = vector.load %arg7[%c0_17, %c0_18] : memref<1x64xf32, #tpu.memory_space<vmem>>, vector<1x64xf32>
    %27 = vector.broadcast %26 : vector<1x64xf32> to vector<8x64xf32>
    %28 = arith.addf %25, %27 : vector<8x64xf32>
    %29 = math.tanh %28 : vector<8x64xf32>
    %c0_19 = arith.constant 0 : index
    %c0_20 = arith.constant 0 : index
    %30 = vector.load %arg8[%c0_19, %c0_20] : memref<8x64xf32, #tpu.memory_space<vmem>>, vector<8x64xf32>
    tpu.vector_store %arg8[%c0_19, %c0_20], %29 {strides = array<i32>} : memref<8x64xf32, #tpu.memory_space<vmem>>, vector<8x64xf32>,
    return
  }
  func.func @transform_0(%arg0: i32) -> (i32, i32) {
    %c0_i32 = arith.constant 0 : i32
    %c0_i32_0 = arith.constant 0 : i32
    return %arg0, %c0_i32 : i32, i32
  }
  func.func @transform_1(%arg0: i32) -> (i32, i32) {
    %c0_i32 = arith.constant 0 : i32
    %c0_i32_0 = arith.constant 0 : i32
    %c0_i32_1 = arith.constant 0 : i32
    return %c0_i32, %c0_i32_0 : i32, i32
  }
  func.func @transform_2(%arg0: i32) -> (i32, i32) {
    %c0_i32 = arith.constant 0 : i32
    %c0_i32_0 = arith.constant 0 : i32
    %c0_i32_1 = arith.constant 0 : i32
    return %c0_i32, %c0_i32_0 : i32, i32
  }
  func.func @transform_3(%arg0: i32) -> (i32, i32) {
    %c0_i32 = arith.constant 0 : i32
    %c0_i32_0 = arith.constant 0 : i32
    %c0_i32_1 = arith.constant 0 : i32
    return %c0_i32, %c0_i32_0 : i32, i32
  }
  func.func @transform_4(%arg0: i32) -> (i32, i32) {
    %c0_i32 = arith.constant 0 : i32
    %c0_i32_0 = arith.constant 0 : i32
    %c0_i32_1 = arith.constant 0 : i32
    return %c0_i32, %c0_i32_0 : i32, i32
  }
  func.func @transform_5(%arg0: i32) -> (i32, i32) {
    %c0_i32 = arith.constant 0 : i32
    %c0_i32_0 = arith.constant 0 : i32
    %c0_i32_1 = arith.constant 0 : i32
    return %c0_i32, %c0_i32_0 : i32, i32
  }
  func.func @transform_6(%arg0: i32) -> (i32, i32) {
    %c0_i32 = arith.constant 0 : i32
    %c0_i32_0 = arith.constant 0 : i32
    %c0_i32_1 = arith.constant 0 : i32
    return %c0_i32, %c0_i32_0 : i32, i32
  }
  func.func @transform_7(%arg0: i32) -> (i32, i32) {
    %c0_i32 = arith.constant 0 : i32
    %c0_i32_0 = arith.constant 0 : i32
    return %arg0, %c0_i32 : i32, i32
  }
}

</mosaic_0001>

<bundles_post_ra>
// kernel: tpu_custom_call.1
= control target key start
LH: loop header
LB: loop body
LE: loop exit
PB: predicated region body
PF: predicated region fallthrough
CT: control target
= control target key end

     0   :  { %12 = vsyncpa [#allocation3], 0  ;;  %s899_s0 = inlined_call_operand.vmem [shape: f32[8,32], index: 0, kind: input, shape index: {}]   ;;  %s900_s1 = inlined_call_operand.vmem [shape: bf16[32,256], index: 1, kind: input, shape index: {}]   ;;  %s901_s2 = inlined_call_operand.vmem [shape: f32[1,256], index: 2, kind: input, shape index: {}]   ;;  %s902_s3 = inlined_call_operand.hbm [shape: bf16[256,256], index: 3, kind: input, shape index: {}]   ;;  %s903_s4 = inlined_call_operand.vmem [shape: f32[1,256], index: 4, kind: input, shape index: {}]   ;;  %s904_s5 = inlined_call_operand.vmem [shape: bf16[256,64], index: 5, kind: input, shape index: {}]   ;;  %s905_s6 = inlined_call_operand.vmem [shape: f32[1,64], index: 6, kind: input, shape index: {}]   ;;  %s906_s7 = inlined_call_operand.hbm [shape: f32[8,64], index: 7, kind: output, shape index: {}]  }
   0x1   :  { %13 = vsyncpa [#allocation4], 0  ;;  %s776_s24 = smov [#allocation2]  }
   0x2   :  { %s25_s25 = sshll.u32 %s776_s24, 4  ;;  %s26_s25 = int_to_ptr.vmem [resolvable:$true] %s25_s25 }
   0x3   :  { %s740_s26 = scalar_lea.vmem %s26_s25, 4096  ;;  %p745_p1 = scmp.lt.s32.totalorder %s26_s25, %s26_s25 }
   0x4   :  { %p741_p0 = scmp.ne.s32.totalorder %s26_s25, %s740_s26  ;;  %p746_p2 = scmp.lt.s32.totalorder %s740_s26, %s740_s26 }
   0x6   :  { %p747_p3 = por %p746_p2, %p745_p1 }
   0x8   :  { %p748_p4 = pnand %p747_p3, %p741_p0 }
   0xa   :  { %751 = shalt.err (!%p748_p4)
}
   0xb   :  { %s777_s27 = smov 128   ;;  %s778_s28 = smov 8  }
   0xc   :  { %31 = dma.hbm_to_vmem [thread:$0]  %s902_s3, 4096, %s26_s25, [#allocation3], %s777_s27, %s777_s27, %s778_s28  }
   0xd   :  { %772 = dma.done.wait [#allocation3], 4096  }
   0xe   :  { %773 = vsyncadd [#allocation3], 4294963200  ;;  %v779_v0 = vmov 0   ;;  %v660_v1 = vld [vmem:[%s900_s1 + $0x14] ss:$8 sps:$4 sm:$0xff]   ;;  %v42_v5 = vld [vmem:[%s899_s0] sm:$0xff]  ;;  %v50_v50 = vlaneseq }
   0xf   :  { %116 = vmatprep.mubr.bf16.mxu0 %v779_v0  ;;  %v662_v2 = vld [vmem:[%s900_s1 + $0x10] ss:$8 sps:$4 sm:$0xff]   ;;  %96 = vmatprep.subr.bf16.mxu0 %v660_v1  ;;  %v663_v3 = vld [vmem:[%s900_s1 + $0x4] ss:$8 sps:$4 sm:$0xff]   ;;  %v665_v4 = vld [vmem:[%s900_s1] ss:$8 sps:$4 sm:$0xff]   ;;  %v43_v9 = vpack.c.bf16 %v42_v5, %v42_v5 }
  0x10   :  { %97 = vmatpush1.bf16.msra.mxu0 %v662_v2  ;;  %v666_v6 = vld [vmem:[#allocation2 + $0x74] ss:$8 sps:$4 sm:$0xff]   ;;  %v668_v7 = vld [vmem:[#allocation2 + $0x70] ss:$8 sps:$4 sm:$0xff]   ;;  %v669_v8 = vld [vmem:[#allocation2 + $0x64] ss:$8 sps:$4 sm:$0xff]  }
  0x11   :  { %98 = vmatprep.subr.bf16.mxu0 %v663_v3  ;;  %337 = vmatprep.subr.bf16.mxu1 %v666_v6  ;;  %v671_v10 = vld [vmem:[#allocation2 + $0x60] ss:$8 sps:$4 sm:$0xff]   ;;  %vm80_vm0 = vcmask 261120   ;;  %v672_v11 = vld [vmem:[#allocation2 + $0x54] ss:$8 sps:$4 sm:$0xff]   ;;  %v51_v51 = vshrl.u32 %v50_v50, 7 }
  0x12   :  { %338 = vmatpush1.bf16.msra.mxu1 %v668_v7  ;;  %v674_v12 = vld [vmem:[#allocation2 + $0x50] ss:$8 sps:$4 sm:$0xff]   ;;  %v675_v13 = vld [vmem:[#allocation2 + $0x44] ss:$8 sps:$4 sm:$0xff]   ;;  %v677_v14 = vld [vmem:[#allocation2 + $0x40] ss:$8 sps:$4 sm:$0xff]  }
  0x13   :  { %339 = vmatprep.subr.bf16.mxu1 %v669_v8  ;;  %v678_v15 = vld [vmem:[#allocation2 + $0x34] ss:$8 sps:$4 sm:$0xff]   ;;  %v680_v16 = vld [vmem:[#allocation2 + $0x30] ss:$8 sps:$4 sm:$0xff]   ;;  %v681_v17 = vld [vmem:[#allocation2 + $0x24] ss:$8 sps:$4 sm:$0xff]  }
  0x14   :  { %99 = vmatpush1.bf16.msra.mxu0 %v665_v4  ;;  %v683_v18 = vld [vmem:[#allocation2 + $0x20] ss:$8 sps:$4 sm:$0xff]   ;;  %v684_v19 = vld [vmem:[#allocation2 + $0x14] ss:$8 sps:$4 sm:$0xff]   ;;  %v686_v20 = vld [vmem:[#allocation2 + $0x10] ss:$8 sps:$4 sm:$0xff]  }
  0x15   :  { %v687_v21 = vld [vmem:[#allocation2 + $0x4] ss:$8 sps:$4 sm:$0xff]   ;;  %v689_v22 = vld [vmem:[#allocation2] ss:$8 sps:$4 sm:$0xff]   ;;  %v690_v23 = vld [vmem:[#allocation2 + $0xf4] ss:$8 sps:$4 sm:$0xff]  }
  0x16   :  { %340 = vmatpush1.bf16.msra.mxu1 %v671_v10  ;;  %v692_v24 = vld [vmem:[#allocation2 + $0xf0] ss:$8 sps:$4 sm:$0xff]   ;;  %v693_v25 = vld [vmem:[#allocation2 + $0xe4] ss:$8 sps:$4 sm:$0xff]   ;;  %v695_v26 = vld [vmem:[#allocation2 + $0xe0] ss:$8 sps:$4 sm:$0xff]  }
  0x17   :  { %583 = vmatmul.mubr.msk.bf16.vlgmr.msra.gmra.mxu0 %vm80_vm0, %v43_v9  ;;  %341 = vmatprep.subr.bf16.mxu1 %v672_v11  ;;  %v696_v27 = vld [vmem:[#allocation2 + $0xd4] ss:$8 sps:$4 sm:$0xff]   ;;  %v698_v28 = vld [vmem:[#allocation2 + $0xd0] ss:$8 sps:$4 sm:$0xff]   ;;  %v699_v29 = vld [vmem:[#allocation2 + $0xc4] ss:$8 sps:$4 sm:$0xff]  }
  0x18   :  { %v701_v30 = vld [vmem:[#allocation2 + $0xc0] ss:$8 sps:$4 sm:$0xff]   ;;  %v702_v31 = vld [vmem:[#allocation2 + $0xb4] ss:$8 sps:$4 sm:$0xff]   ;;  %v704_v32 = vld [vmem:[#allocation2 + $0xb0] ss:$8 sps:$4 sm:$0xff]  }
  0x19   :  { %v705_v33 = vld [vmem:[#allocation2 + $0xa4] ss:$8 sps:$4 sm:$0xff]   ;;  %v707_v34 = vld [vmem:[#allocation2 + $0xa0] ss:$8 sps:$4 sm:$0xff]   ;;  %v708_v35 = vld [vmem:[#allocation2 + $0x94] ss:$8 sps:$4 sm:$0xff]  }
  0x1a   :  { %342 = vmatpush1.bf16.msra.mxu1 %v674_v12  ;;  %v710_v36 = vld [vmem:[#allocation2 + $0x90] ss:$8 sps:$4 sm:$0xff]   ;;  %v711_v37 = vld [vmem:[#allocation2 + $0x84] ss:$8 sps:$4 sm:$0xff]   ;;  %v713_v38 = vld [vmem:[#allocation2 + $0x80] ss:$8 sps:$4 sm:$0xff]  }
  0x1b   :  { %343 = vmatprep.subr.bf16.mxu1 %v675_v13  ;;  %v714_v39 = vld [vmem:[%s904_s5 + $0x78] sm:$0xff]   ;;  %v716_v41 = vld [vmem:[%s904_s5 + $0x70] sm:$0xff]   ;;  %v718_v43 = vld [vmem:[%s904_s5 + $0x68] sm:$0xff]   ;;  %v52_v52 = vsub.s32 0, %v51_v51  ;;  %v56_v54 = vsub.s32 1, %v51_v51  ;;  %s780_s24 = smov [#allocation5]  }
  0x1c   :  { %v715_v40 = vld [vmem:[%s904_s5 + $0x38] sm:$0xff]   ;;  %633 = vmatprep.subr.bf16.mxu0 %v714_v39  ;;  %v717_v42 = vld [vmem:[%s904_s5 + $0x30] sm:$0xff]   ;;  %v719_v44 = vld [vmem:[%s904_s5 + $0x28] sm:$0xff]   ;;  %s570_s25 = sshll.u32 %s780_s24, 4  ;;  %vm562_vm5 = vcmask 523264   ;;  %s571_s25 = int_to_ptr.vmem [resolvable:$true] %s570_s25 }
  0x1d   :  { %634 = vmatpush3.bf16.msra.mxu0 %v715_v40  ;;  %v720_v45 = vld [vmem:[%s904_s5 + $0x60] sm:$0xff]   ;;  %v722_v47 = vld [vmem:[%s904_s5 + $0x58] sm:$0xff]   ;;  %v724_v49 = vld [vmem:[%s904_s5 + $0x50] sm:$0xff]   ;;  %s752_s26 = scalar_lea.vmem %s571_s25, 128  ;;  %p757_p6 = scmp.lt.s32.totalorder %s571_s25, %s571_s25 }
  0x1e   :  { %344 = vmatpush1.bf16.msra.mxu1 %v677_v14  ;;  %635 = vmatprep.subr.bf16.mxu0 %v716_v41  ;;  %v721_v46 = vld [vmem:[%s904_s5 + $0x20] sm:$0xff]   ;;  %v723_v48 = vld [vmem:[%s904_s5 + $0x18] sm:$0xff]   ;;  %v725_v5 = vld [vmem:[%s904_s5 + $0x10] sm:$0xff]   ;;  %p753_p5 = scmp.ne.s32.totalorder %s571_s25, %s752_s26  ;;  %p758_p7 = scmp.lt.s32.totalorder %s752_s26, %s752_s26 }
  0x1f   :  { %345 = vmatprep.subr.bf16.mxu1 %v678_v15  ;;  %v48_v53 = vld [vmem:[%s901_s2] sm:$0x3]  ;;  %v726_v6 = vld [vmem:[%s904_s5 + $0x48] sm:$0xff]  }
  0x20   :  { %v53_v55 = vrot.slane %v48_v53, %v52_v52  ;;  %v57_v56 = vrot.slane %v48_v53, %v56_v54  ;;  %v727_v7 = vld [vmem:[%s904_s5 + $0x8] sm:$0xff]   ;;  %v728_v8 = vld [vmem:[%s904_s5 + $0x40] sm:$0xff]   ;;  %p759_p8 = por %p758_p7, %p757_p6 }
  0x21   :  { %636 = vmatpush3.bf16.msra.mxu0 %v717_v42  ;;  %v729_v9 = vld [vmem:[%s904_s5] sm:$0xff]  }
  0x22   :  { %346 = vmatpush1.bf16.msra.mxu1 %v680_v16  ;;  %637 = vmatprep.subr.bf16.mxu0 %v718_v43  ;;  %v165_v10 = vld [vmem:[%s903_s4] sm:$0x3]  ;;  %p760_p9 = pnand %p759_p8, %p753_p5 }
  0x23   :  { %347 = vmatprep.subr.bf16.mxu1 %v681_v17  ;;  %v170_v11 = vrot.slane %v165_v10, %v52_v52  ;;  %v174_v12 = vrot.slane %v165_v10, %v56_v54 }
  0x25   :  { %638 = vmatpush3.bf16.msra.mxu0 %v719_v44 }
  0x26   :  { %348 = vmatpush1.bf16.msra.mxu1 %v683_v18  ;;  %639 = vmatprep.subr.bf16.mxu0 %v720_v45 }
  0x27   :  { %349 = vmatprep.subr.bf16.mxu1 %v684_v19 }
  0x29   :  { %640 = vmatpush3.bf16.msra.mxu0 %v721_v46 }
  0x2a   :  { %350 = vmatpush1.bf16.msra.mxu1 %v686_v20  ;;  %641 = vmatprep.subr.bf16.mxu0 %v722_v47 }
  0x2b   :  { %351 = vmatprep.subr.bf16.mxu1 %v687_v21 }
  0x2d   :  { %642 = vmatpush3.bf16.msra.mxu0 %v723_v48 }
  0x2e   :  { %352 = vmatpush1.bf16.msra.mxu1 %v689_v22  ;;  %643 = vmatprep.subr.bf16.mxu0 %v724_v49 }
  0x2f   :  { %353 = vmatprep.subr.bf16.mxu1 %v690_v23 }
  0x31   :  { %644 = vmatpush3.bf16.msra.mxu0 %v725_v5 }
  0x32   :  { %354 = vmatpush2.bf16.msra.mxu1 %v692_v24  ;;  %645 = vmatprep.subr.bf16.mxu0 %v726_v6 }
  0x33   :  { %355 = vmatprep.subr.bf16.mxu1 %v693_v25 }
  0x35   :  { %646 = vmatpush3.bf16.msra.mxu0 %v727_v7 }
  0x36   :  { %356 = vmatpush2.bf16.msra.mxu1 %v695_v26  ;;  %647 = vmatprep.subr.bf16.mxu0 %v728_v8  ;;  %v616_v26 = vld [vmem:[%s905_s6] ss:$0 sm:$0xff] }
  0x37   :  { %357 = vmatprep.subr.bf16.mxu1 %v696_v27 }
  0x39   :  { %648 = vmatpush3.bf16.msra.mxu0 %v729_v9 }
  0x3a   :  { %358 = vmatpush2.bf16.msra.mxu1 %v698_v28 }
  0x3b   :  { %359 = vmatprep.subr.bf16.mxu1 %v699_v29 }
  0x3e   :  { %360 = vmatpush2.bf16.msra.mxu1 %v701_v30 }
  0x3f   :  { %361 = vmatprep.subr.bf16.mxu1 %v702_v31 }
  0x42   :  { %362 = vmatpush2.bf16.msra.mxu1 %v704_v32 }
  0x43   :  { %363 = vmatprep.subr.bf16.mxu1 %v705_v33 }
  0x46   :  { %364 = vmatpush2.bf16.msra.mxu1 %v707_v34 }
  0x47   :  { %365 = vmatprep.subr.bf16.mxu1 %v708_v35 }
  0x4a   :  { %366 = vmatpush2.bf16.msra.mxu1 %v710_v36 }
  0x4b   :  { %367 = vmatprep.subr.bf16.mxu1 %v711_v37 }
  0x4e   :  { %368 = vmatpush2.bf16.msra.mxu1 %v713_v38 }
  0xd7   :  { %v118_v57 = vpop.f32.mrf.mxu0 }
  0xd8   :  { %v119_v58 = vadd.f32 %v118_v57, %v53_v55 }
  0xd9   :  { %v120_v59 = vpop.f32.mrf.mxu0 }
  0xda   :  { %vm125_vm1 = vcmp.gt.f32.partialorder %v119_v58, 0.0  ;;  %v127_v60 = vmul.f32 0.2, %v119_v58  ;;  %v121_v61 = vadd.f32 %v120_v59, %v57_v56 }
  0xdb   :  { %v122_v62 = vpop.f32.mrf.mxu0 }
  0xdc   :  { %vm126_vm2 = vcmp.gt.f32.partialorder %v121_v61, 0.0  ;;  %v128_v63 = vmul.f32 0.2, %v121_v61  ;;  %v129_v1 = vsel %vm125_vm1, %v119_v58, %v127_v60 }
  0xdd   :  { %v123_v0 = vpop.f32.mrf.mxu0  ;;  %v131_v4 = vpack.c.bf16 %v129_v1, %v129_v1 }
  0xde   :  { %v130_v2 = vsel %vm126_vm2, %v121_v61, %v128_v63 }
  0xdf   :  { %v132_v3 = vpack.c.bf16 %v130_v2, %v130_v2 }
  0xe1   :  { %369 = vmatprep.mubr.bf16.mxu1 %v132_v3 }
  0xe2   :  { %370 = vmatmul.mubr.bf16.vlgmr.msra.gmra.mxu1 %v131_v4 }
 0x1a2   :  { %v371_v13 = vpop.f32.mrf.mxu1 }
 0x1a3   :  { %v372_v14 = vadd.f32 %v371_v13, %v170_v11 }
 0x1a4   :  { %v373_v15 = vpop.f32.mrf.mxu1 }
 0x1a5   :  { %vm378_vm3 = vcmp.gt.f32.partialorder %v372_v14, 0.0  ;;  %v380_v16 = vmul.f32 0.2, %v372_v14  ;;  %v374_v17 = vadd.f32 %v373_v15, %v174_v12 }
 0x1a6   :  { %v375_v18 = vpop.f32.mrf.mxu1 }
 0x1a7   :  { %vm379_vm4 = vcmp.gt.f32.partialorder %v374_v17, 0.0  ;;  %v381_v19 = vmul.f32 0.2, %v374_v17  ;;  %v382_v20 = vsel %vm378_vm3, %v372_v14, %v380_v16 }
 0x1a8   :  { %v376_v21 = vpop.f32.mrf.mxu1  ;;  %v384_v24 = vpack.c.bf16 %v382_v20, %v382_v20 }
 0x1a9   :  { %v383_v22 = vsel %vm379_vm4, %v374_v17, %v381_v19 }
 0x1aa   :  { %v385_v23 = vpack.c.bf16 %v383_v22, %v383_v22 }
 0x1ac   :  { %553 = vmatprep.mubr.bf16.mxu0 %v385_v23 }
 0x1ad   :  { %554 = vmatmul.mubr.bf16.vlgmr.msra.gmra.mxu0 %v384_v24 }
 0x26d   :  { %v649_v25 = vpop.f32.mrf.mxu0 }
 0x26f   :  { %v650_v27 = vpop.f32.mrf.mxu0 }
 0x270   :  { %v651_v28 = vadd.f32 %v650_v27, %v649_v25 }
 0x271   :  { %v652_v29 = vpop.f32.mrf.mxu0 }
 0x272   :  { %v556_v30 = vadd.f32 %v651_v28, %v616_v26 }
 0x273   :  { %v653_v31 = vpop.f32.mrf.mxu0 }
 0x274   :  { %730 = vtanh.f32 %v556_v30 }
 0x281   :  { %v731_v32 = vpop.eup %730 }
 0x282   :  { %563 = vst.msk [vmem:[#allocation5] sm:$0xff] %vm562_vm5, %v731_v32 }
 0x283   :  { %763 = shalt.err (!%p760_p9)
}
 0x284   :  { %573 = dma.vmem_to_hbm [thread:$0]  %s571_s25, 128, %s906_s7, [#allocation4]  }
 0x285   :  { %774 = dma.done.wait [#allocation4], 128  }
 0x286   :  { %775 = vsyncadd [#allocation4], 4294967168 }
 0x287   :  { %577 = vsyncpa [#allocation3], 1 }
 0x288   :  { %578 = vsyncpa [#allocation4], 1 }

</bundles_post_ra>
